<compile_context>
chip_gen: v7x
topology: tpu7x:2x2x1
jax: 0.10.0
libtpu: 0.0.40
codegen_flags: <defaults>
</compile_context>

<pallas_src>
import functools
import math

import jax
import jax.numpy as jnp
from jax.experimental import pallas as pl
from jax.experimental.pallas import tpu as pltpu

_NEG_LARGE = -1e30   # finite "minus infinity" for vocab padding / LSE init


# ----------------------------------------------------------------------------
# Pass 1: fused matmul + bias + online log-sum-exp statistics.
# ----------------------------------------------------------------------------
def _logits_lse_kernel(x_ref, w_ref, b_ref, logits_ref, lse_ref,
                       m_ref, l_ref, *, compute_dtype):
    j = pl.program_id(1)

    @pl.when(j == 0)
    def _():
        m_ref[...] = jnp.full(m_ref.shape, _NEG_LARGE, m_ref.dtype)
        l_ref[...] = jnp.zeros(l_ref.shape, l_ref.dtype)

    # (tm, D) @ (D, tn) on the MXU; bf16 operands, f32 result.
    tile = jnp.dot(
        x_ref[...].astype(compute_dtype),
        w_ref[...],
        preferred_element_type=jnp.float32,
    ) + b_ref[...]
    logits_ref[...] = tile

    # Online LSE update across vocab tiles (all statistics in f32).
    t_max = jnp.max(tile, axis=-1, keepdims=True)
    m_new = jnp.maximum(m_ref[...], t_max)
    l_ref[...] = l_ref[...] * jnp.exp(m_ref[...] - m_new) + jnp.sum(
        jnp.exp(tile - m_new), axis=-1, keepdims=True)
    m_ref[...] = m_new

    @pl.when(j == pl.num_programs(1) - 1)
    def _():
        lse_ref[...] = m_ref[...] + jnp.log(l_ref[...])


# ----------------------------------------------------------------------------
# Pass 2: normalize (bandwidth-only): out = logits - lse.
# ----------------------------------------------------------------------------
def _normalize_kernel(logits_ref, lse_ref, o_ref):
    o_ref[...] = (logits_ref[...] - lse_ref[...]).astype(o_ref.dtype)


# ----------------------------------------------------------------------------
# Tile / padding selection helpers.
# ----------------------------------------------------------------------------
def _round_up(x, m):
    return ((x + m - 1) // m) * m


def _pick_row_tile(m, cap, target=256):
    """Row tile (multiple of 8, <= cap) minimizing padding; prefers 256/128."""
    cap = max(8, (cap // 8) * 8)
    cands = [c for c in (target, 128, _round_up(min(m, target), 8)) if c <= cap]
    if not cands:
        cands = [cap]
    best_t, best_pad = None, None
    for t in sorted(set(cands), reverse=True):
        pad = _round_up(m, t) - m
        if best_pad is None or pad < best_pad:
            best_t, best_pad = t, pad
    return best_t, m + best_pad


def _pick_col_tile(n, target=512):
    """Vocab tile: full dim if n <= target, else a 128-multiple dividing the
    128-padded vocab (minimal padding)."""
    if n <= target:
        return n, n
    n_pad = _round_up(n, 128)
    t = (target // 128) * 128
    while t > 128 and n_pad % t:
        t -= 128
    return t, n_pad


def _vmem_capacity_bytes():
    try:
        return int(pltpu.get_tpu_info().vmem_capacity_bytes)
    except Exception:
        return 64 * 1024 * 1024   # conservative (v7x); v5e/v6e have 128 MiB


# ----------------------------------------------------------------------------
# Wrapper: log_softmax(x @ w + b, axis=-1)
# ----------------------------------------------------------------------------
def projection_log_softmax(x, w, b, *, compute_dtype=jnp.bfloat16,
                           tm_target=256, tn_target=512):
    orig_shape = x.shape
    D = orig_shape[-1]
    M = int(math.prod(orig_shape[:-1]))
    N = w.shape[-1]
    out_dtype = x.dtype

    x2d = x.reshape(M, D)
    # Weight should already live in bf16 (see init_projection_params); cast
    # once here if it does not.
    w_c = w if w.dtype == compute_dtype else w.astype(compute_dtype)
    b2d = b.astype(jnp.float32).reshape(1, N)

    # ---- generation-aware tile selection --------------------------------
    capacity = _vmem_capacity_bytes()
    vmem_limit = int(0.75 * capacity)
    xb = jnp.dtype(x.dtype).itemsize
    wb = jnp.dtype(compute_dtype).itemsize
    ob = jnp.dtype(out_dtype).itemsize

    tn, N_pad = _pick_col_tile(N, tn_target)

    # Bound the row tile so x-resident + weight + output blocks stay well
    # inside VMEM (double-buffered, per-dtype itemsizes).
    budget = int(0.5 * capacity)
    w_bufs = 2 * D * tn * wb + 2 * tn * 4
    per_row = 2 * D * xb + 2 * tn * 4 + 32
    tm_cap = max(8, (((budget - w_bufs) // per_row) // 8) * 8) if budget > w_bufs else 8
    tm, M_pad = _pick_row_tile(M, min(tm_target, tm_cap) if tm_cap >= 8 else 8,
                               target=tm_target)
    gm, gn = M_pad // tm, N_pad // tn

    # ---- padding (sliced off at the end) ---------------------------------
    if M_pad != M:
        x2d = jnp.pad(x2d, ((0, M_pad - M), (0, 0)))
    if N_pad != N:
        w_c = jnp.pad(w_c, ((0, 0), (0, N_pad - N)))
        b2d = jnp.pad(b2d, ((0, 0), (0, N_pad - N)), constant_values=_NEG_LARGE)

    # ---- VMEM sanity (per-dtype itemsizes) -------------------------------
    vmem_est = (2 * tm * D * xb + 2 * D * tn * wb + 2 * tn * 4
                + 2 * tm * tn * 4 + 2 * tm * 4 + 2 * tm * 4)
    assert vmem_est <= vmem_limit, (
        f"tile selection exceeds VMEM budget: {vmem_est} > {vmem_limit}")

    # ---- pass 1: fused matmul + bias + online LSE ------------------------
    cost1 = pl.CostEstimate(
        flops=2 * M_pad * D * N_pad,
        transcendentals=M_pad * N_pad + M_pad * (gn + 1),
        bytes_accessed=(M_pad * D * xb + gm * D * N_pad * wb + N_pad * 4
                        + M_pad * N_pad * 4 + M_pad * 4),
    )
    logits, lse = pl.pallas_call(
        functools.partial(_logits_lse_kernel, compute_dtype=compute_dtype),
        out_shape=(jax.ShapeDtypeStruct((M_pad, N_pad), jnp.float32),
                   jax.ShapeDtypeStruct((M_pad, 1), jnp.float32)),
        grid_spec=pltpu.PrefetchScalarGridSpec(
            num_scalar_prefetch=0,
            grid=(gm, gn),
            in_specs=[
                pl.BlockSpec((tm, D), lambda i, j: (i, 0)),   # x row block (resident)
                pl.BlockSpec((D, tn), lambda i, j: (0, j)),   # bf16 weight tile
                pl.BlockSpec((1, tn), lambda i, j: (0, j)),   # bias tile
            ],
            out_specs=(
                pl.BlockSpec((tm, tn), lambda i, j: (i, j)),  # f32 logits
                pl.BlockSpec((tm, 1), lambda i, j: (i, 0)),   # per-row LSE
            ),
            scratch_shapes=[pltpu.VMEM((tm, 1), jnp.float32),   # running max
                            pltpu.VMEM((tm, 1), jnp.float32)],  # running sum-exp
        ),
        compiler_params=pltpu.CompilerParams(
            dimension_semantics=("parallel", "arbitrary"),
            vmem_limit_bytes=vmem_limit,
        ),
        cost_estimate=cost1,
    )(x2d, w_c, b2d)

    # ---- pass 2: normalize ------------------------------------------------
    cost2 = pl.CostEstimate(
        flops=M_pad * N_pad,
        transcendentals=0,
        bytes_accessed=M_pad * N_pad * 4 + M_pad * 4 + M_pad * N_pad * ob,
    )
    out_pad = pl.pallas_call(
        _normalize_kernel,
        out_shape=jax.ShapeDtypeStruct((M_pad, N_pad), out_dtype),
        grid_spec=pltpu.PrefetchScalarGridSpec(
            num_scalar_prefetch=0,
            grid=(gm, gn),
            in_specs=[
                pl.BlockSpec((tm, tn), lambda i, j: (i, j)),
                pl.BlockSpec((tm, 1), lambda i, j: (i, 0)),
            ],
            out_specs=pl.BlockSpec((tm, tn), lambda i, j: (i, j)),
        ),
        compiler_params=pltpu.CompilerParams(
            dimension_semantics=("parallel", "parallel"),
            vmem_limit_bytes=vmem_limit,
        ),
        cost_estimate=cost2,
    )(logits, lse)

    out = out_pad[:M, :N] if (M_pad != M or N_pad != N) else out_pad
    return out.reshape(*orig_shape[:-1], N)


# ----------------------------------------------------------------------------
# Parameter init (nn.Linear-style; weight stored pre-transposed and bf16 at
# rest) and pure-JAX reference.
# ----------------------------------------------------------------------------
def init_projection_params(key, d_model, vocab_size, *, weight_dtype=jnp.bfloat16):
    kw, kb = jax.random.split(key)
    bound = 1.0 / math.sqrt(d_model)
    w = jax.random.uniform(kw, (d_model, vocab_size), jnp.float32, -bound, bound)
    b = jax.random.uniform(kb, (vocab_size,), jnp.float32, -bound, bound)
    return {"w": w.astype(weight_dtype), "b": b}


def reference_projection(x, w, b):
    return jax.nn.log_softmax(x @ w.astype(jnp.float32) + b, axis=-1)


if __name__ == "__main__":
    key = jax.random.PRNGKey(0)
    kx, kp, kx2, kp2 = jax.random.split(key, 4)

    # Small canonical test (module-sized toy shapes).
    B, S, d_model, vocab_size = 2, 8, 32, 48
    x = jax.random.normal(kx, (B, S, d_model), jnp.float32)
    params = init_projection_params(kp, d_model, vocab_size)
    out = jax.block_until_ready(projection_log_softmax(x, params["w"], params["b"]))
    ref = reference_projection(x, params["w"], params["b"])
    assert out.shape == (B, S, vocab_size)
    assert jnp.allclose(out, ref, atol=2e-2, rtol=2e-2), "mismatch (small shapes)"

    # Second test exercising the tiled paths: multiple vocab tiles, vocab
    # padding (-1e30 bias) and row padding, with the online LSE across tiles.
    B2, S2, d2, v2 = 2, 13, 96, 1000
    x2 = jax.random.normal(kx2, (B2, S2, d2), jnp.float32)
    p2 = init_projection_params(kp2, d2, v2)
    out2 = jax.block_until_ready(projection_log_softmax(x2, p2["w"], p2["b"]))
    ref2 = reference_projection(x2, p2["w"], p2["b"])
    assert out2.shape == (B2, S2, v2)
    assert jnp.allclose(out2, ref2, atol=2e-2, rtol=2e-2), "mismatch (tiled/padded)"

    print("KERNEL_OK")
</pallas_src>

<mosaic_0001>
module attributes {stable_mosaic.version = 11 : i64} {
  func.func @_logits_lse_kernel(%arg0: i32, %arg1: i32, %arg2: memref<16x32xf32, #tpu.memory_space<vmem>>, %arg3: memref<32x48xbf16, #tpu.memory_space<vmem>>, %arg4: memref<1x48xf32, #tpu.memory_space<vmem>>, %arg5: memref<16x48xf32, #tpu.memory_space<vmem>>, %arg6: memref<16x1xf32, #tpu.memory_space<vmem>>, %arg7: memref<16x1xf32, #tpu.memory_space<vmem>>, %arg8: memref<16x1xf32, #tpu.memory_space<vmem>>) attributes {dimension_semantics = [#tpu.dimension_semantics<parallel>, #tpu.dimension_semantics<arbitrary>], iteration_bounds = array<i64: 1, 1>, scalar_prefetch = 0 : i64, scratch_operands = 2 : i64, tpu.core_type = #tpu.core_type<tc>, window_params = [{transform_indices = @transform_0, window_bounds = array<i64: 16, 32>}, {transform_indices = @transform_1, window_bounds = array<i64: 32, 48>}, {transform_indices = @transform_2, window_bounds = array<i64: 1, 48>}, {transform_indices = @transform_3, window_bounds = array<i64: 16, 48>}, {transform_indices = @transform_4, window_bounds = array<i64: 16, 1>}]} {
    %c0_i32 = arith.constant 0 : i32
    %0 = arith.cmpi eq, %arg1, %c0_i32 : i32
    %1 = arith.extui %0 : i1 to i32
    %c0_i32_0 = arith.constant 0 : i32
    %2 = arith.cmpi ne, %1, %c0_i32_0 : i32
    scf.if %2 {
      %cst_22 = arith.constant -1.000000e+30 : f32
      %31 = vector.broadcast %cst_22 : f32 to vector<16x1xf32>
      %c0_23 = arith.constant 0 : index
      %c0_24 = arith.constant 0 : index
      %32 = vector.load %arg7[%c0_23, %c0_24] : memref<16x1xf32, #tpu.memory_space<vmem>>, vector<16x1xf32>
      tpu.vector_store %arg7[%c0_23, %c0_24], %31 {strides = array<i32>} : memref<16x1xf32, #tpu.memory_space<vmem>>, vector<16x1xf32>,
      %cst_25 = arith.constant 0.000000e+00 : f32
      %33 = vector.broadcast %cst_25 : f32 to vector<16x1xf32>
      %c0_26 = arith.constant 0 : index
      %c0_27 = arith.constant 0 : index
      %34 = vector.load %arg8[%c0_26, %c0_27] : memref<16x1xf32, #tpu.memory_space<vmem>>, vector<16x1xf32>
      tpu.vector_store %arg8[%c0_26, %c0_27], %33 {strides = array<i32>} : memref<16x1xf32, #tpu.memory_space<vmem>>, vector<16x1xf32>,
    } else {
    }
    %c0 = arith.constant 0 : index
    %c0_1 = arith.constant 0 : index
    %3 = vector.load %arg2[%c0, %c0_1] : memref<16x32xf32, #tpu.memory_space<vmem>>, vector<16x32xf32>
    %4 = arith.truncf %3 : vector<16x32xf32> to vector<16x32xbf16>
    %c0_2 = arith.constant 0 : index
    %c0_3 = arith.constant 0 : index
    %5 = vector.load %arg3[%c0_2, %c0_3] : memref<32x48xbf16, #tpu.memory_space<vmem>>, vector<32x48xbf16>
    %cst = arith.constant dense<0.000000e+00> : vector<16x48xf32>
    %6 = tpu.matmul %4, %5, %cst {dimension_numbers = #tpu.dot_dimension_numbers<[1], [0], [0], [1], [0, 0, 1, 1], [], []>} : vector<16x32xbf16>, vector<32x48xbf16>, vector<16x48xf32> -> vector<16x48xf32>
    %c0_4 = arith.constant 0 : index
    %c0_5 = arith.constant 0 : index
    %7 = vector.load %arg4[%c0_4, %c0_5] : memref<1x48xf32, #tpu.memory_space<vmem>>, vector<1x48xf32>
    %8 = vector.broadcast %7 : vector<1x48xf32> to vector<16x48xf32>
    %9 = arith.addf %6, %8 : vector<16x48xf32>
    %c0_6 = arith.constant 0 : index
    %c0_7 = arith.constant 0 : index
    %10 = vector.load %arg5[%c0_6, %c0_7] : memref<16x48xf32, #tpu.memory_space<vmem>>, vector<16x48xf32>
    tpu.vector_store %arg5[%c0_6, %c0_7], %9 {strides = array<i32>} : memref<16x48xf32, #tpu.memory_space<vmem>>, vector<16x48xf32>,
    %cst_8 = arith.constant dense<0xFF800000> : vector<16xf32>
    %11 = vector.multi_reduction <maximumf>, %9, %cst_8 [1] : vector<16x48xf32> to vector<16xf32>
    %12 = vector.shape_cast %11 : vector<16xf32> to vector<16x1xf32>
    %c0_9 = arith.constant 0 : index
    %c0_10 = arith.constant 0 : index
    %13 = vector.load %arg7[%c0_9, %c0_10] : memref<16x1xf32, #tpu.memory_space<vmem>>, vector<16x1xf32>
    %14 = arith.maximumf %13, %12 : vector<16x1xf32>
    %c0_11 = arith.constant 0 : index
    %c0_12 = arith.constant 0 : index
    %15 = vector.load %arg8[%c0_11, %c0_12] : memref<16x1xf32, #tpu.memory_space<vmem>>, vector<16x1xf32>
    %c0_13 = arith.constant 0 : index
    %c0_14 = arith.constant 0 : index
    %16 = vector.load %arg7[%c0_13, %c0_14] : memref<16x1xf32, #tpu.memory_space<vmem>>, vector<16x1xf32>
    %17 = arith.subf %16, %14 : vector<16x1xf32>
    %18 = math.exp %17 : vector<16x1xf32>
    %19 = arith.mulf %15, %18 : vector<16x1xf32>
    %20 = vector.broadcast %14 : vector<16x1xf32> to vector<16x48xf32>
    %21 = arith.subf %9, %20 : vector<16x48xf32>
    %22 = math.exp %21 : vector<16x48xf32>
    %cst_15 = arith.constant dense<0.000000e+00> : vector<16xf32>
    %23 = vector.multi_reduction <add>, %22, %cst_15 [1] : vector<16x48xf32> to vector<16xf32>
    %24 = vector.shape_cast %23 : vector<16xf32> to vector<16x1xf32>
    %25 = arith.addf %19, %24 : vector<16x1xf32>
    %c0_16 = arith.constant 0 : index
    %c0_17 = arith.constant 0 : index
    %26 = vector.load %arg8[%c0_16, %c0_17] : memref<16x1xf32, #tpu.memory_space<vmem>>, vector<16x1xf32>
    tpu.vector_store %arg8[%c0_16, %c0_17], %25 {strides = array<i32>} : memref<16x1xf32, #tpu.memory_space<vmem>>, vector<16x1xf32>,
    %c0_18 = arith.constant 0 : index
    %c0_19 = arith.constant 0 : index
    %27 = vector.load %arg7[%c0_18, %c0_19] : memref<16x1xf32, #tpu.memory_space<vmem>>, vector<16x1xf32>
    tpu.vector_store %arg7[%c0_18, %c0_19], %14 {strides = array<i32>} : memref<16x1xf32, #tpu.memory_space<vmem>>, vector<16x1xf32>,
    %c0_i32_20 = arith.constant 0 : i32
    %28 = arith.cmpi eq, %arg1, %c0_i32_20 : i32
    %29 = arith.extui %28 : i1 to i32
    %c0_i32_21 = arith.constant 0 : i32
    %30 = arith.cmpi ne, %29, %c0_i32_21 : i32
    scf.if %30 {
      %c0_22 = arith.constant 0 : index
      %c0_23 = arith.constant 0 : index
      %31 = vector.load %arg7[%c0_22, %c0_23] : memref<16x1xf32, #tpu.memory_space<vmem>>, vector<16x1xf32>
      %c0_24 = arith.constant 0 : index
      %c0_25 = arith.constant 0 : index
      %32 = vector.load %arg8[%c0_24, %c0_25] : memref<16x1xf32, #tpu.memory_space<vmem>>, vector<16x1xf32>
      %33 = math.log %32 : vector<16x1xf32>
      %34 = arith.addf %31, %33 : vector<16x1xf32>
      %c0_26 = arith.constant 0 : index
      %c0_27 = arith.constant 0 : index
      %35 = vector.load %arg6[%c0_26, %c0_27] : memref<16x1xf32, #tpu.memory_space<vmem>>, vector<16x1xf32>
      tpu.vector_store %arg6[%c0_26, %c0_27], %34 {strides = array<i32>} : memref<16x1xf32, #tpu.memory_space<vmem>>, vector<16x1xf32>,
    } else {
    }
    return
  }
  func.func @transform_0(%arg0: i32, %arg1: i32) -> (i32, i32) {
    %c0_i32 = arith.constant 0 : i32
    %c0_i32_0 = arith.constant 0 : i32
    return %arg0, %c0_i32 : i32, i32
  }
  func.func @transform_1(%arg0: i32, %arg1: i32) -> (i32, i32) {
    %c0_i32 = arith.constant 0 : i32
    %c0_i32_0 = arith.constant 0 : i32
    return %c0_i32, %arg1 : i32, i32
  }
  func.func @transform_2(%arg0: i32, %arg1: i32) -> (i32, i32) {
    %c0_i32 = arith.constant 0 : i32
    %c0_i32_0 = arith.constant 0 : i32
    return %c0_i32, %arg1 : i32, i32
  }
  func.func @transform_3(%arg0: i32, %arg1: i32) -> (i32, i32) {
    %c0_i32 = arith.constant 0 : i32
    return %arg0, %arg1 : i32, i32
  }
  func.func @transform_4(%arg0: i32, %arg1: i32) -> (i32, i32) {
    %c0_i32 = arith.constant 0 : i32
    %c0_i32_0 = arith.constant 0 : i32
    return %arg0, %c0_i32 : i32, i32
  }
}

</mosaic_0001>

<bundles_post_ra>
// kernel: tpu_custom_call.1
= control target key start
LH: loop header
LB: loop body
LE: loop exit
PB: predicated region body
PF: predicated region fallthrough
CT: control target
= control target key end

     0   :  { %10 = vsyncpa [#allocation5], 0  ;;  %s432_s0 = inlined_call_operand.hbm [shape: f32[16,32], index: 0, kind: input, shape index: {}]   ;;  %s433_s1 = inlined_call_operand.hbm [shape: bf16[32,48], index: 1, kind: input, shape index: {}]   ;;  %s434_s2 = inlined_call_operand.vmem [shape: f32[1,48], index: 2, kind: input, shape index: {}]   ;;  %s435_s3 = inlined_call_operand.hbm [shape: f32[16,48], index: 3, kind: output, shape index: {0}]   ;;  %s436_s4 = inlined_call_operand.vmem [shape: f32[16,1], index: 4, kind: output, shape index: {1}]  }
   0x1   :  { %11 = vsyncpa [#allocation8], 0 }
   0x2   :  { %12 = vsyncpa [#allocation6], 0  ;;  %s329_s15 = smov [#allocation4]   ;;  %s257_s19 = scalar_lea.hbm %s432_s0, 256 }
   0x3   :  { %s18_s16 = sshll.u32 %s329_s15, 4  ;;  %p258_p0 = scmp.ne.s32.totalorder %s432_s0, %s257_s19  ;;  %s19_s16 = int_to_ptr.vmem [resolvable:$true] %s18_s16 }
   0x4   :  { %p261_p1 = scmp.lt.u32.totalorder %s257_s19, %s432_s0 }
   0x6   :  { %p263_p2 = pnand %p261_p1, %p258_p0 }
   0x8   :  { %266 = shalt.err (!%p263_p2)
}
   0x9   :  { %s267_s24 = scalar_lea.vmem %s19_s16, 256  ;;  %p272_p4 = scmp.lt.s32.totalorder %s19_s16, %s19_s16 }
   0xa   :  { %p268_p3 = scmp.ne.s32.totalorder %s19_s16, %s267_s24  ;;  %p273_p5 = scmp.lt.s32.totalorder %s267_s24, %s267_s24 }
   0xc   :  { %p274_p6 = por %p273_p5, %p272_p4 }
   0xe   :  { %p275_p7 = pnand %p274_p6, %p268_p3 }
  0x10   :  { %278 = shalt.err (!%p275_p7)
}
  0x11   :  { %s330_s25 = smov 128   ;;  %s331_s26 = smov 8  }
  0x12   :  { %24 = dma.hbm_to_vmem [thread:$0]  %s432_s0, 256, %s19_s16, [#allocation5], %s330_s25, %s330_s25, %s331_s26  }
  0x13   :  { %s332_s29 = smov [#allocation7]   ;;  %s279_s7 = scalar_lea.hbm %s433_s1, 256 }
  0x14   :  { %s30_s30 = sshll.u32 %s332_s29, 4  ;;  %p280_p8 = scmp.ne.s32.totalorder %s433_s1, %s279_s7  ;;  %s31_s30 = int_to_ptr.vmem [resolvable:$true] %s30_s30 }
  0x15   :  { %p283_p9 = scmp.lt.u32.totalorder %s279_s7, %s433_s1 }
  0x17   :  { %p285_p10 = pnand %p283_p9, %p280_p8 }
  0x19   :  { %288 = shalt.err (!%p285_p10)
}
  0x1a   :  { %s289_s12 = scalar_lea.vmem %s31_s30, 256  ;;  %p294_p12 = scmp.lt.s32.totalorder %s31_s30, %s31_s30 }
  0x1b   :  { %p290_p11 = scmp.ne.s32.totalorder %s31_s30, %s289_s12  ;;  %p295_p13 = scmp.lt.s32.totalorder %s289_s12, %s289_s12 }
  0x1d   :  { %p296_p0 = por %p295_p13, %p294_p12 }
  0x1f   :  { %p297_p1 = pnand %p296_p0, %p290_p11 }
  0x21   :  { %300 = shalt.err (!%p297_p1)
}
  0x22   :  { %s333_s0 = smov 64   ;;  %s334_s13 = smov 4  }
  0x23   :  { %36 = dma.hbm_to_vmem [thread:$0]  %s433_s1, 256, %s31_s30, [#allocation8], %s333_s0, %s333_s0, %s334_s13  }
  0x24   :  { %323 = dma.done.wait [#allocation5], 256  }
  0x25   :  { %324 = vsyncadd [#allocation5], 4294967040 }
  0x26   :  { %325 = dma.done.wait [#allocation8], 256  }
  0x27   :  { %326 = vsyncadd [#allocation8], 4294967040  ;;  %vm50_vm0 = vcmask 7168   ;;  %v335_v0 = vmov 0.0   ;;  %vm336_vm1 = vmmov 0   ;;  %v243_v1 = vld [vmem:[#allocation7] sm:$0xff]  }
  0x28   :  { %53 = vst.msk [vmem:[#allocation3] sm:$0xff] %vm50_vm0, %v335_v0  ;;  %54 = vst.msk [vmem:[#allocation3 + $0x8] sm:$0xff] %vm50_vm0, %v335_v0  ;;  %222 = vmatprep.subr.bf16.mxu0 %v335_v0  ;;  %226 = vmatprep.mubr.msk.bf16.mxu0 %vm336_vm1, %v335_v0  ;;  %v244_v2 = vld [vmem:[#allocation7 + $0x8] sm:$0xff]   ;;  %v55_v3 = vld [vmem:[#allocation4] sm:$0xff]  ;;  %vm81_vm2 = vcmask 261120   ;;  %vm126_vm3 = vcmask 392192  }
  0x29   :  { %223 = vmatpush3.bf16.msra.mxu0 %v243_v1  ;;  %v56_v4 = vld [vmem:[#allocation4 + $0x8] sm:$0xff]  ;;  %v337_v6 = vmov -1e+30   ;;  %v215_v7 = vld [vmem:[%s434_s2] ss:$0 sm:$0xff]  ;;  %v338_v16 = vmov 0  }
  0x2a   :  { %224 = vmatprep.subr.bf16.mxu0 %v335_v0  ;;  %v57_v5 = vpack.c.bf16 %v56_v4, %v55_v3  ;;  %51 = vst.msk [vmem:[#allocation2] sm:$0xff] %vm50_vm0, %v337_v6  ;;  %52 = vst.msk [vmem:[#allocation2 + $0x8] sm:$0xff] %vm50_vm0, %v337_v6  ;;  %241 = vset.pattern.permute.xlu1 %v338_v16  ;;  %s339_s2 = smov [#allocation9]  }
  0x2b   :  { %242 = vset.pattern.permute.xlu0 %v338_v16  ;;  %s198_s17 = sshll.u32 %s339_s2, 4  ;;  %s199_s17 = int_to_ptr.vmem [resolvable:$true] %s198_s17 }
  0x2c   :  { %s301_s18 = scalar_lea.vmem %s199_s17, 256  ;;  %p306_p3 = scmp.lt.s32.totalorder %s199_s17, %s199_s17 }
  0x2d   :  { %225 = vmatpush3.bf16.msra.mxu0 %v244_v2  ;;  %p302_p2 = scmp.ne.s32.totalorder %s199_s17, %s301_s18  ;;  %p307_p4 = scmp.lt.s32.totalorder %s301_s18, %s301_s18 }
  0x2f   :  { %p308_p5 = por %p307_p4, %p306_p3 }
  0x30   :  { %227 = vmatmul.mubr.msk.bf16.vlgmr.msra.gmra.mrb[0].mxu0 %vm81_vm2, %v57_v5 }
  0x31   :  { %v135_v17 = vld [vmem:[#allocation2] sm:$0xff]  ;;  %v136_v20 = vld [vmem:[#allocation2 + $0x8] sm:$0xff]  ;;  %p309_p6 = pnand %p308_p5, %p302_p2 }
 0x103   :  { %v119_v8 = vpop.f32.mrb[0].mxu0 }
 0x104   :  { %v120_v9 = vadd.f32 %v215_v7, %v119_v8  ;;  %v228_v10 = vpop.f32.mrb[1].mxu0 }
 0x105   :  { %v122_v11 = vpop.f32.mrb[2].mxu0 }
 0x106   :  { %v123_v12 = vadd.f32 %v215_v7, %v122_v11  ;;  %v229_v13 = vpop.f32.mrb[3].mxu0  ;;  %v129_v14 = vsel %vm126_vm3, %v120_v9, -inf  ;;  %127 = vst.msk [vmem:[#allocation9] sm:$0xff] %vm126_vm3, %v120_v9 }
 0x107   :  { %130 = vmax.xlane.f32.xlu0 %v129_v14 }
 0x108   :  { %128 = vst.msk [vmem:[#allocation9 + $0x8] sm:$0xff] %vm126_vm3, %v123_v12  ;;  %v132_v15 = vsel %vm126_vm3, %v123_v12, -inf }
 0x10b   :  { %133 = vmax.xlane.f32.xlu0 %v132_v15 }
 0x194   :  { %v131_v18 = vpop.xlane.xlu0 %130 }
 0x195   :  { %v137_v19 = vmax.f32 %v135_v17, %v131_v18 }
 0x197   :  { %v141_v21 = vsub.f32 %v135_v17, %v137_v19  ;;  %176 = vst.msk [vmem:[#allocation2] sm:$0xff] %vm50_vm0, %v137_v19  ;;  %151 = vperm.xlu1 %241, %v137_v19  }
 0x198   :  { %v134_v22 = vpop.xlane.xlu0 %133 }
 0x199   :  { %v138_v23 = vmax.f32 %v136_v20, %v134_v22 }
 0x19b   :  { %v142_v24 = vsub.f32 %v136_v20, %v138_v23  ;;  %177 = vst.msk [vmem:[#allocation2 + $0x8] sm:$0xff] %vm50_vm0, %v138_v23  ;;  %156 = vperm.xlu1 %241, %v138_v23  }
 0x216   :  { %v152_v25 = vpop.permute.xlu1 %151 }
 0x217   :  { %v159_v26 = vsub.f32 %v120_v9, %v152_v25 }
 0x219   :  { %v161_v27 = vmul.f32 1.442695, %v159_v26 }
 0x21a   :  { %v157_v28 = vpop.permute.xlu1 %156 }
 0x21b   :  { %245 = vpow2.f32 %v161_v27  ;;  %v160_v29 = vsub.f32 %v123_v12, %v157_v28 }
 0x21d   :  { %v163_v30 = vmul.f32 1.442695, %v160_v29 }
 0x21f   :  { %247 = vpow2.f32 %v163_v30 }
 0x225   :  { %v246_v31 = vpop.eup %245 }
 0x226   :  { %v165_v32 = vsel %vm126_vm3, %v246_v31, 0.0 }
 0x227   :  { %166 = vadd.xlane.f32.xlu0 %v165_v32 }
 0x229   :  { %v248_v33 = vpop.eup %247 }
 0x22a   :  { %v168_v34 = vsel %vm126_vm3, %v248_v33, 0.0 }
 0x22b   :  { %169 = vadd.xlane.f32.xlu1 %v168_v34 }
 0x22c   :  { %312 = shalt.err (!%p309_p6)
}
 0x22d   :  { %s313_s21 = scalar_lea.hbm %s435_s3, 256 }
 0x22e   :  { %p314_p7 = scmp.ne.s32.totalorder %s435_s3, %s313_s21  ;;  %p317_p8 = scmp.lt.u32.totalorder %s313_s21, %s435_s3 }
 0x230   :  { %p319_p9 = pnand %p317_p8, %p314_p7 }
 0x232   :  { %322 = shalt.err (!%p319_p9)
}
 0x233   :  { %204 = dma.vmem_to_hbm [thread:$0]  %s199_s17, 256, %s435_s3, [#allocation6], %s330_s25, %s330_s25, %s331_s26   ;;  %v143_v35 = vmul.f32 1.442695, %v141_v21  ;;  %v145_v36 = vmul.f32 1.442695, %v142_v24 }
 0x234   :  { %v139_v38 = vld [vmem:[#allocation3] sm:$0xff]  ;;  %v140_v42 = vld [vmem:[#allocation3 + $0x8] sm:$0xff]  ;;  %v181_v51 = vld [vmem:[#allocation2] sm:$0xff] }
 0x235   :  { %249 = vpow2.f32 %v143_v35  ;;  %v182_v55 = vld [vmem:[#allocation2 + $0x8] sm:$0xff] }
 0x236   :  { %251 = vpow2.f32 %v145_v36 }
 0x23f   :  { %v250_v37 = vpop.eup %249 }
 0x240   :  { %v147_v39 = vmul.f32 %v250_v37, %v139_v38  ;;  %v252_v40 = vpop.eup %251 }
 0x241   :  { %v148_v44 = vmul.f32 %v252_v40, %v140_v42 }
 0x2b4   :  { %v167_v41 = vpop.xlane.xlu0 %166 }
 0x2b5   :  { %v171_v43 = vadd.f32 %v167_v41, %v147_v39 }
 0x2b7   :  { %174 = vst.msk [vmem:[#allocation3] sm:$0xff] %vm50_vm0, %v171_v43 }
 0x2b8   :  { %v170_v45 = vpop.xlane.xlu1 %169 }
 0x2b9   :  { %v172_v46 = vadd.f32 %v170_v45, %v148_v44 }
 0x2bb   :  { %175 = vst.msk [vmem:[#allocation3 + $0x8] sm:$0xff] %vm50_vm0, %v172_v46 }
 0x2be   :  { %v183_v47 = vld [vmem:[#allocation3] sm:$0xff] }
 0x2bf   :  { %253 = vlog2.f32 %v183_v47 }
 0x2c2   :  { %v184_v48 = vld [vmem:[#allocation3 + $0x8] sm:$0xff] }
 0x2c3   :  { %255 = vlog2.f32 %v184_v48 }
 0x2c9   :  { %v254_v49 = vpop.eup %253 }
 0x2ca   :  { %v186_v50 = vmul.f32 0.6931472, %v254_v49 }
 0x2cc   :  { %v189_v52 = vadd.f32 %v186_v50, %v181_v51 }
 0x2cd   :  { %v256_v53 = vpop.eup %255 }
 0x2ce   :  { %191 = vst.msk [vmem:[%s436_s4] sm:$0xff] %vm50_vm0, %v189_v52  ;;  %v188_v54 = vmul.f32 0.6931472, %v256_v53 }
 0x2d0   :  { %v190_v56 = vadd.f32 %v188_v54, %v182_v55 }
 0x2d2   :  { %192 = vst.msk [vmem:[%s436_s4 + $0x8] sm:$0xff] %vm50_vm0, %v190_v56 }
 0x2d3   :  { %327 = dma.done.wait [#allocation6], 256  }
 0x2d4   :  { %328 = vsyncadd [#allocation6], 4294967040 }
 0x2d5   :  { %212 = vsyncpa [#allocation5], 1 }
 0x2d6   :  { %213 = vsyncpa [#allocation8], 1 }
 0x2d7   :  { %214 = vsyncpa [#allocation6], 1 }

</bundles_post_ra>
